<compile_context>
chip_gen: v5e
topology: v5e:2x2
jax: 0.10.0
libtpu: 0.0.40
codegen_flags: <defaults>
</compile_context>

<pallas_src>
import numpy as np
import jax
import jax.numpy as jnp
from jax.experimental import pallas as pl
from jax.experimental.pallas import tpu as pltpu


def _downsample_kernel(x_ref, w_ref, shift_ref, o_ref):
    # x_ref:     (1, 2, 2, M, Cin)  bf16 -- 2x2 pool-window quadrant planes (M = toh*WH)
    # w_ref:     (Cin, Cout)        bf16 -- 1x1 conv weight, BN scale folded in
    # shift_ref: (1, Cout)          f32  -- folded BN shift
    # o_ref:     (1, M, Cout)       bf16 -- pooled rows for this tile
    w = w_ref[...]
    shift = shift_ref[...]
    acc = None
    # Per-quadrant 1x1 conv on the MXU (f32 accumulation) + BN shift + ReLU; the
    # 2x2 average pool is then just the mean of the four quadrant results.
    # Keeping the conv per quadrant holds the live f32 intermediate at (M, Cout).
    for a in range(2):
        for b in range(2):
            yq = jnp.dot(x_ref[0, a, b], w, preferred_element_type=jnp.float32)
            yq = jnp.maximum(yq + shift, 0.0)
            acc = yq if acc is None else acc + yq
    o_ref[0] = (acc * 0.25).astype(o_ref.dtype)


def _round_up(v, m):
    return -(-v // m) * m


def _vmem_capacity_bytes():
    try:
        return int(pltpu.get_tpu_info().vmem_capacity_bytes)
    except Exception:
        return 64 * 1024 * 1024   # conservative default (v7x per-core VMEM)


def _choose_tile_oh(n_oh, wh, cin, cout, budget_bytes, min_tiles=1):
    """Largest pooled-row tile fitting budget_bytes that still yields >= min_tiles tiles."""
    cap = n_oh if min_tiles <= 1 else max(1, -(-n_oh // min_tiles))
    consts = 2 * (cin * cout * 2 + cout * 4)          # weight + shift blocks
    per_row = wh * (2 * 4 * cin * 2                   # input block, bf16, double-buffered
                    + 2 * cout * 2                    # output block, bf16, double-buffered
                    + 2 * cout * 4)                   # live f32: accumulator + one quadrant
    toh = max(1, (budget_bytes - consts) // max(per_row, 1))
    # TODO(synk): add a second tiling axis (over WH or Cout) as a fallback when even
    # toh == 1 exceeds the budget (very large W * Cin).
    return int(min(cap, toh))


def downsample_forward(x_nchw, conv_w, bn_gamma, bn_beta, bn_mean, bn_var,
                       use_dropout=False, eps=1e-5):
    """Fused 1x1 conv + BatchNorm(eval) + ReLU + avg_pool2d(2, ceil_mode=True).

    x_nchw: (N, Cin, H, W) float32.  Returns (N, Cout, ceil(H/2), ceil(W/2)) float32.
    """
    del use_dropout   # nn.Dropout is identity in eval mode
    # TODO(synk): training-mode dropout (pltpu PRNG) and batch-stat BN not implemented.
    N, Cin, H, W = x_nchw.shape
    Cout = conv_w.shape[0]
    Ho, Wo = -(-H // 2), -(-W // 2)

    # Fold eval-mode BatchNorm into the conv weight (scale) + per-channel shift.
    scale = bn_gamma / jnp.sqrt(bn_var + eps)                            # (Cout,)
    shift = (bn_beta - bn_mean * scale).astype(jnp.float32)              # (Cout,)
    w = (conv_w.reshape(Cout, Cin).astype(jnp.float32) * scale[:, None]).T
    w = w.astype(jnp.bfloat16)                                           # (Cin, Cout)
    shift2d = shift.reshape(1, Cout)

    # Generation-aware VMEM budget: v5e/v6e have 128 MiB/core, v7x has 64 MiB/core.
    vmem_cap = _vmem_capacity_bytes()
    if vmem_cap >= 96 * 1024 * 1024:
        vmem_limit, tile_budget = 96 * 1024 * 1024, 48 * 1024 * 1024
    else:
        vmem_limit, tile_budget = 40 * 1024 * 1024, 24 * 1024 * 1024

    # Pad W to a multiple of 32 so WH = Wp//2 is a multiple of 16 (bf16 sublane tile).
    Wp = _round_up(max(W, 1), 32)
    WH = Wp // 2

    # Pooled-row tile; require >= 2 grid steps when N == 1 so both v7x cores get work.
    min_tiles = 2 if (N == 1 and Ho >= 2) else 1
    toh = _choose_tile_oh(Ho, WH, Cin, Cout, tile_budget, min_tiles)
    Ho_pad = _round_up(Ho, toh)
    Hp = 2 * Ho_pad
    n_tiles = Ho_pad // toh

    # NCHW f32 -> (N, 2, 2, Ho_pad*WH, Cin) bf16 "pixel unshuffle":
    #   x_r[n, a, b, oh*WH + ow, c] = x[n, c, 2*oh + a, 2*ow + b]
    # One fused XLA pad+transpose+cast pass (the channels-last layout is what the
    # MXU matmul needs anyway).
    # TODO(synk): with an NHWC-bf16 producer/consumer this pre/post layout pass disappears.
    x = x_nchw.astype(jnp.bfloat16)
    x = jnp.pad(x, ((0, 0), (0, 0), (0, Hp - H), (0, Wp - W)))
    x = x.reshape(N, Cin, Ho_pad, 2, WH, 2)
    x = jnp.transpose(x, (0, 3, 5, 2, 4, 1))                             # (N,2,2,Ho_pad,WH,Cin)
    x = x.reshape(N, 2, 2, Ho_pad * WH, Cin)

    out = pl.pallas_call(
        _downsample_kernel,
        out_shape=jax.ShapeDtypeStruct((N, Ho_pad * WH, Cout), jnp.bfloat16),
        grid_spec=pltpu.PrefetchScalarGridSpec(
            num_scalar_prefetch=0,
            grid=(N, n_tiles),
            in_specs=[
                pl.BlockSpec((1, 2, 2, toh * WH, Cin), lambda n, t: (n, 0, 0, t, 0)),
                pl.BlockSpec((Cin, Cout), lambda n, t: (0, 0)),
                pl.BlockSpec((1, Cout), lambda n, t: (0, 0)),
            ],
            out_specs=pl.BlockSpec((1, toh * WH, Cout), lambda n, t: (n, t, 0)),
        ),
        compiler_params=pltpu.CompilerParams(
            dimension_semantics=("parallel", "parallel"),
            vmem_limit_bytes=vmem_limit,
        ),
    )(x, w, shift2d)

    # (N, Ho_pad*WH, Cout) bf16 -> NCHW f32, dropping padded rows/cols.
    out = out.reshape(N, Ho_pad, WH, Cout)[:, :Ho, :Wo, :].astype(jnp.float32)

    if (H % 2) or (W % 2):
        # ceil_mode windows overhanging the input: every zero-padded pixel
        # contributed exactly relu(shift_c) to the window sum; remove it and
        # divide by the true valid-element count (PyTorch avg_pool2d rule).
        relu_shift = jnp.maximum(shift, 0.0)                             # (Cout,)
        cnt_h = np.full((Ho,), 2.0, np.float32)
        cnt_w = np.full((Wo,), 2.0, np.float32)
        if H % 2:
            cnt_h[-1] = 1.0
        if W % 2:
            cnt_w[-1] = 1.0
        cnt = jnp.asarray(np.outer(cnt_h, cnt_w))                        # (Ho, Wo)
        out = (out * 4.0
               - (4.0 - cnt)[None, :, :, None] * relu_shift[None, None, None, :]
               ) / cnt[None, :, :, None]
    return jnp.transpose(out, (0, 3, 1, 2))                              # (N, Cout, Ho, Wo)


def _reference_forward(x, conv_w, gamma, beta, mean, var, eps=1e-5):
    """NumPy reference: 1x1 conv -> BN(eval) -> ReLU -> avg_pool2d(2, ceil_mode=True)."""
    x = np.asarray(x, np.float64)
    N, Cin, H, W = x.shape
    w = np.asarray(conv_w, np.float64).reshape(-1, Cin)
    Cout = w.shape[0]
    y = np.einsum("nchw,oc->nohw", x, w)
    sc = np.asarray(gamma, np.float64) / np.sqrt(np.asarray(var, np.float64) + eps)
    sh = np.asarray(beta, np.float64) - np.asarray(mean, np.float64) * sc
    y = np.maximum(y * sc[None, :, None, None] + sh[None, :, None, None], 0.0)
    Ho, Wo = -(-H // 2), -(-W // 2)
    out = np.zeros((N, Cout, Ho, Wo), np.float64)
    for oh in range(Ho):
        for ow in range(Wo):
            win = y[:, :, 2 * oh:min(2 * oh + 2, H), 2 * ow:min(2 * ow + 2, W)]
            out[:, :, oh, ow] = win.mean(axis=(2, 3))   # divisor = #valid elements
    return out


if __name__ == "__main__":
    key = jax.random.PRNGKey(0)

    def make_case(k, N, Cin, Cout, H, W):
        k1, k2, k3, k4, k5, k6 = jax.random.split(k, 6)
        x = jax.random.normal(k1, (N, Cin, H, W), jnp.float32)
        bound = 1.0 / np.sqrt(Cin)
        conv_w = jax.random.uniform(k2, (Cout, Cin, 1, 1), jnp.float32, -bound, bound)
        gamma = 1.0 + 0.1 * jax.random.normal(k3, (Cout,), jnp.float32)
        beta = 0.05 * jax.random.normal(k4, (Cout,), jnp.float32)
        mean = 0.1 * jax.random.normal(k5, (Cout,), jnp.float32)
        var = 1.0 + 0.1 * jax.random.uniform(k6, (Cout,), jnp.float32)
        return x, conv_w, gamma, beta, mean, var

    k_even, k_odd = jax.random.split(key)

    # Even spatial dims (pool windows tile exactly).
    args = make_case(k_even, N=2, Cin=4, Cout=8, H=16, W=16)
    out = jax.block_until_ready(downsample_forward(*args, use_dropout=True))
    ref = _reference_forward(*args)
    assert out.shape == (2, 8, 8, 8), out.shape
    np.testing.assert_allclose(np.asarray(out), ref, rtol=3e-2, atol=3e-2)

    # Odd spatial dims + N=1 (exercises ceil_mode boundary divisors and the
    # >=2-grid-steps rule for v7x megacore).
    args = make_case(k_odd, N=1, Cin=3, Cout=5, H=7, W=9)
    out = jax.block_until_ready(downsample_forward(*args, use_dropout=False))
    ref = _reference_forward(*args)
    assert out.shape == (1, 5, 4, 5), out.shape
    np.testing.assert_allclose(np.asarray(out), ref, rtol=3e-2, atol=3e-2)

    print("KERNEL_OK")
</pallas_src>

<mosaic_0001>
module attributes {stable_mosaic.version = 11 : i64} {
  func.func @_downsample_kernel(%arg0: i32, %arg1: i32, %arg2: memref<1x2x2x128x4xbf16, #tpu.memory_space<vmem>>, %arg3: memref<4x8xbf16, #tpu.memory_space<vmem>>, %arg4: memref<1x8xf32, #tpu.memory_space<vmem>>, %arg5: memref<1x128x8xbf16, #tpu.memory_space<vmem>>) attributes {dimension_semantics = [#tpu.dimension_semantics<parallel>, #tpu.dimension_semantics<parallel>], iteration_bounds = array<i64: 2, 1>, scalar_prefetch = 0 : i64, scratch_operands = 0 : i64, tpu.core_type = #tpu.core_type<tc>, window_params = [{transform_indices = @transform_0, window_bounds = array<i64: 1, 2, 2, 128, 4>}, {pipeline_mode = #tpu.pipeline_mode<synchronous>, transform_indices = @transform_1, window_bounds = array<i64: 4, 8>}, {pipeline_mode = #tpu.pipeline_mode<synchronous>, transform_indices = @transform_2, window_bounds = array<i64: 1, 8>}, {transform_indices = @transform_3, window_bounds = array<i64: 1, 128, 8>}]} {
    %c0 = arith.constant 0 : index
    %c0_0 = arith.constant 0 : index
    %0 = vector.load %arg3[%c0, %c0_0] : memref<4x8xbf16, #tpu.memory_space<vmem>>, vector<4x8xbf16>
    %c0_1 = arith.constant 0 : index
    %c0_2 = arith.constant 0 : index
    %1 = vector.load %arg4[%c0_1, %c0_2] : memref<1x8xf32, #tpu.memory_space<vmem>>, vector<1x8xf32>
    %c0_3 = arith.constant 0 : index
    %c0_4 = arith.constant 0 : index
    %c0_5 = arith.constant 0 : index
    %c0_6 = arith.constant 0 : index
    %c0_7 = arith.constant 0 : index
    %2 = vector.load %arg2[%c0_3, %c0_4, %c0_5, %c0_6, %c0_7] : memref<1x2x2x128x4xbf16, #tpu.memory_space<vmem>>, vector<1x1x1x128x4xbf16>
    %3 = vector.shape_cast %2 : vector<1x1x1x128x4xbf16> to vector<128x4xbf16>
    %cst = arith.constant dense<0.000000e+00> : vector<128x8xf32>
    %4 = tpu.matmul %3, %0, %cst {dimension_numbers = #tpu.dot_dimension_numbers<[1], [0], [0], [1], [0, 0, 1, 1], [], []>} : vector<128x4xbf16>, vector<4x8xbf16>, vector<128x8xf32> -> vector<128x8xf32>
    %5 = vector.broadcast %1 : vector<1x8xf32> to vector<128x8xf32>
    %6 = arith.addf %4, %5 : vector<128x8xf32>
    %cst_8 = arith.constant 0.000000e+00 : f32
    %7 = vector.broadcast %cst_8 : f32 to vector<128x8xf32>
    %8 = arith.maximumf %6, %7 : vector<128x8xf32>
    %c0_9 = arith.constant 0 : index
    %c0_10 = arith.constant 0 : index
    %c1 = arith.constant 1 : index
    %c0_11 = arith.constant 0 : index
    %c0_12 = arith.constant 0 : index
    %9 = vector.load %arg2[%c0_9, %c0_10, %c1, %c0_11, %c0_12] : memref<1x2x2x128x4xbf16, #tpu.memory_space<vmem>>, vector<1x1x1x128x4xbf16>
    %10 = vector.shape_cast %9 : vector<1x1x1x128x4xbf16> to vector<128x4xbf16>
    %cst_13 = arith.constant dense<0.000000e+00> : vector<128x8xf32>
    %11 = tpu.matmul %10, %0, %cst_13 {dimension_numbers = #tpu.dot_dimension_numbers<[1], [0], [0], [1], [0, 0, 1, 1], [], []>} : vector<128x4xbf16>, vector<4x8xbf16>, vector<128x8xf32> -> vector<128x8xf32>
    %12 = vector.broadcast %1 : vector<1x8xf32> to vector<128x8xf32>
    %13 = arith.addf %11, %12 : vector<128x8xf32>
    %cst_14 = arith.constant 0.000000e+00 : f32
    %14 = vector.broadcast %cst_14 : f32 to vector<128x8xf32>
    %15 = arith.maximumf %13, %14 : vector<128x8xf32>
    %16 = arith.addf %8, %15 : vector<128x8xf32>
    %c0_15 = arith.constant 0 : index
    %c1_16 = arith.constant 1 : index
    %c0_17 = arith.constant 0 : index
    %c0_18 = arith.constant 0 : index
    %c0_19 = arith.constant 0 : index
    %17 = vector.load %arg2[%c0_15, %c1_16, %c0_17, %c0_18, %c0_19] : memref<1x2x2x128x4xbf16, #tpu.memory_space<vmem>>, vector<1x1x1x128x4xbf16>
    %18 = vector.shape_cast %17 : vector<1x1x1x128x4xbf16> to vector<128x4xbf16>
    %cst_20 = arith.constant dense<0.000000e+00> : vector<128x8xf32>
    %19 = tpu.matmul %18, %0, %cst_20 {dimension_numbers = #tpu.dot_dimension_numbers<[1], [0], [0], [1], [0, 0, 1, 1], [], []>} : vector<128x4xbf16>, vector<4x8xbf16>, vector<128x8xf32> -> vector<128x8xf32>
    %20 = vector.broadcast %1 : vector<1x8xf32> to vector<128x8xf32>
    %21 = arith.addf %19, %20 : vector<128x8xf32>
    %cst_21 = arith.constant 0.000000e+00 : f32
    %22 = vector.broadcast %cst_21 : f32 to vector<128x8xf32>
    %23 = arith.maximumf %21, %22 : vector<128x8xf32>
    %24 = arith.addf %16, %23 : vector<128x8xf32>
    %c0_22 = arith.constant 0 : index
    %c1_23 = arith.constant 1 : index
    %c1_24 = arith.constant 1 : index
    %c0_25 = arith.constant 0 : index
    %c0_26 = arith.constant 0 : index
    %25 = vector.load %arg2[%c0_22, %c1_23, %c1_24, %c0_25, %c0_26] : memref<1x2x2x128x4xbf16, #tpu.memory_space<vmem>>, vector<1x1x1x128x4xbf16>
    %26 = vector.shape_cast %25 : vector<1x1x1x128x4xbf16> to vector<128x4xbf16>
    %cst_27 = arith.constant dense<0.000000e+00> : vector<128x8xf32>
    %27 = tpu.matmul %26, %0, %cst_27 {dimension_numbers = #tpu.dot_dimension_numbers<[1], [0], [0], [1], [0, 0, 1, 1], [], []>} : vector<128x4xbf16>, vector<4x8xbf16>, vector<128x8xf32> -> vector<128x8xf32>
    %28 = vector.broadcast %1 : vector<1x8xf32> to vector<128x8xf32>
    %29 = arith.addf %27, %28 : vector<128x8xf32>
    %cst_28 = arith.constant 0.000000e+00 : f32
    %30 = vector.broadcast %cst_28 : f32 to vector<128x8xf32>
    %31 = arith.maximumf %29, %30 : vector<128x8xf32>
    %32 = arith.addf %24, %31 : vector<128x8xf32>
    %cst_29 = arith.constant 2.500000e-01 : f32
    %33 = vector.broadcast %cst_29 : f32 to vector<128x8xf32>
    %34 = arith.mulf %32, %33 : vector<128x8xf32>
    %35 = arith.truncf %34 : vector<128x8xf32> to vector<128x8xbf16>
    %c0_30 = arith.constant 0 : index
    %c0_31 = arith.constant 0 : index
    %c0_32 = arith.constant 0 : index
    %36 = vector.load %arg5[%c0_30, %c0_31, %c0_32] : memref<1x128x8xbf16, #tpu.memory_space<vmem>>, vector<1x128x8xbf16>
    %37 = vector.shape_cast %36 : vector<1x128x8xbf16> to vector<128x8xbf16>
    %38 = vector.shape_cast %35 : vector<128x8xbf16> to vector<1x128x8xbf16>
    tpu.vector_store %arg5[%c0_30, %c0_31, %c0_32], %38 {strides = array<i32>} : memref<1x128x8xbf16, #tpu.memory_space<vmem>>, vector<1x128x8xbf16>,
    return
  }
  func.func @transform_0(%arg0: i32, %arg1: i32) -> (i32, i32, i32, i32, i32) {
    %c0_i32 = arith.constant 0 : i32
    %c0_i32_0 = arith.constant 0 : i32
    %c0_i32_1 = arith.constant 0 : i32
    %c0_i32_2 = arith.constant 0 : i32
    return %arg0, %c0_i32, %c0_i32_0, %arg1, %c0_i32_1 : i32, i32, i32, i32, i32
  }
  func.func @transform_1(%arg0: i32, %arg1: i32) -> (i32, i32) {
    %c0_i32 = arith.constant 0 : i32
    %c0_i32_0 = arith.constant 0 : i32
    %c0_i32_1 = arith.constant 0 : i32
    return %c0_i32, %c0_i32_0 : i32, i32
  }
  func.func @transform_2(%arg0: i32, %arg1: i32) -> (i32, i32) {
    %c0_i32 = arith.constant 0 : i32
    %c0_i32_0 = arith.constant 0 : i32
    %c0_i32_1 = arith.constant 0 : i32
    return %c0_i32, %c0_i32_0 : i32, i32
  }
  func.func @transform_3(%arg0: i32, %arg1: i32) -> (i32, i32, i32) {
    %c0_i32 = arith.constant 0 : i32
    %c0_i32_0 = arith.constant 0 : i32
    return %arg0, %arg1, %c0_i32 : i32, i32, i32
  }
}

</mosaic_0001>

<bundles_post_ra>
// kernel: tpu_custom_call.1
= control target key start
LH: loop header
LB: loop body
LE: loop exit
PB: predicated region body
PF: predicated region fallthrough
CT: control target
= control target key end

     0   :  { %s1310_s12 = smov 0   ;;  %s1312_s13 = smov 0   ;;  %s1519_s0 = inlined_call_operand.vmem [shape: bf16[2,2,2,128,4], index: 0, kind: input, shape index: {}]   ;;  %s1520_s1 = inlined_call_operand.vmem [shape: bf16[4,8], index: 1, kind: input, shape index: {}]   ;;  %s1521_s2 = inlined_call_operand.vmem [shape: f32[1,8], index: 2, kind: input, shape index: {}]   ;;  %s1522_s3 = inlined_call_operand.vmem [shape: bf16[2,128,8], index: 3, kind: output, shape index: {}]  }
   0x1   :  { %s1314_s14 = smov 0  }
   0x2 LB: > { %s25_s15 = sadd.s32 1, %s1284_s13  ;;  %p992_p0 = scmp.ge.s32.totalorder %s1288_s14, 1  ;;  %s1288_s14 = sphi %s1314_s14, %s13_s14   ;;  %s1284_s13 = sphi %s1312_s13, %s1524_s13   ;;  %s1280_s12 = sphi %s1310_s12, %s1523_s12  }
   0x3   : > { %p27_p1 = scmp.ge.s32.totalorder %s25_s15, 2  ;;  %p158_p2 = scmp.lt.s32.totalorder %s1288_s14, 3 }
   0x5   : > { %s1526_s15 = smov (%p27_p1, %s25_s15), 0  ;;  %p159_p3 = pnand %p992_p0, %p158_p2 }
   0x6   : > { %p191_p4 = scmp.lt.s32.totalorder (!%p159_p3), %s1280_s12, 1 }
   0x7   : > { %162 = sbr.rel (%p159_p3) target bundleno = 283 (0x11b), region = 32 }
   0xc   : > { %v211_v0 = vld [vmem:[%s1520_s1] sm:$0x3]  ;;  %vm297_vm0 = vcmask 1041408   ;;  %s1528_s12 = smov (!%p191_p4, %s1280_s12), 1  ;;  %vm272_vm1 = vcmask 31744   ;;  %vm884_vm2 = vcmask 60416  }
   0xd   : > { %v299_v1 = vsel %vm297_vm0, %v211_v0, 0  ;;  %s1207_s18 = sshll.u32 %s1528_s12, 8  ;;  %v1406_v34 = vld [vmem:[%s1521_s2] ss:$0 sm:$0xff]  ;;  %s1208_s24 = sshll.u32 %s1528_s12, 6 }
   0xe   : > { %308 = vmatpush.bf16.msra.mxu0 %v299_v1  ;;  %454 = vmatpush.bf16.msra.mxu1 %v299_v1  ;;  %s1337_s21 = scalar_lea.vmem %s1519_s0, %s1207_s18  ;;  %s1420_s27 = scalar_lea.vmem %s1522_s3, %s1208_s24 }
   0xf   : > { %616 = vmatpush.bf16.msra.mxu2 %v299_v1  ;;  %778 = vmatpush.bf16.msra.mxu3 %v299_v1  ;;  %v1209_v2 = vld [vmem:[%s1337_s21] sm:$0xff]  ;;  %v1210_v6 = vld [vmem:[%s1337_s21 + $0x8] sm:$0xff]  ;;  %v1211_v10 = vld [vmem:[%s1337_s21 + $0x10] sm:$0xff] }
  0x10   : > { %v1217_v3 = vld [vmem:[%s1337_s21 + $0x40] sm:$0xff]  ;;  %v1218_v7 = vld [vmem:[%s1337_s21 + $0x48] sm:$0xff]  ;;  %v1219_v11 = vld [vmem:[%s1337_s21 + $0x50] sm:$0xff] }
  0x11   : > { %v1225_v4 = vld [vmem:[%s1337_s21 + $0x80] sm:$0xff]  ;;  %1029 = vmatmul.msk.bf16.vlgmr.msra.gmra.mxu0 %vm272_vm1, %v1209_v2  ;;  %1085 = vmatmul.msk.bf16.vlgmr.msra.gmra.mxu1 %vm272_vm1, %v1217_v3  ;;  %v1226_v8 = vld [vmem:[%s1337_s21 + $0x88] sm:$0xff]  ;;  %v1227_v12 = vld [vmem:[%s1337_s21 + $0x90] sm:$0xff] }
  0x12   : > { %v1233_v5 = vld [vmem:[%s1337_s21 + $0xc0] sm:$0xff]  ;;  %1141 = vmatmul.msk.bf16.vlgmr.msra.gmra.mxu2 %vm272_vm1, %v1225_v4  ;;  %v1234_v9 = vld [vmem:[%s1337_s21 + $0xc8] sm:$0xff]  ;;  %v1235_v13 = vld [vmem:[%s1337_s21 + $0xd0] sm:$0xff] }
  0x13   : > { %1197 = vmatmul.msk.bf16.vlgmr.msra.gmra.mxu3 %vm272_vm1, %v1233_v5  ;;  %v1212_v14 = vld [vmem:[%s1337_s21 + $0x18] sm:$0xff]  ;;  %v1213_v18 = vld [vmem:[%s1337_s21 + $0x20] sm:$0xff]  ;;  %v1214_v22 = vld [vmem:[%s1337_s21 + $0x28] sm:$0xff] }
  0x14   : > { %v1220_v15 = vld [vmem:[%s1337_s21 + $0x58] sm:$0xff]  ;;  %v1221_v19 = vld [vmem:[%s1337_s21 + $0x60] sm:$0xff]  ;;  %v1222_v23 = vld [vmem:[%s1337_s21 + $0x68] sm:$0xff] }
  0x15   : > { %v1228_v16 = vld [vmem:[%s1337_s21 + $0x98] sm:$0xff]  ;;  %v1229_v20 = vld [vmem:[%s1337_s21 + $0xa0] sm:$0xff]  ;;  %v1230_v24 = vld [vmem:[%s1337_s21 + $0xa8] sm:$0xff] }
  0x16   : > { %v1236_v17 = vld [vmem:[%s1337_s21 + $0xd8] sm:$0xff]  ;;  %v1237_v21 = vld [vmem:[%s1337_s21 + $0xe0] sm:$0xff]  ;;  %v1238_v25 = vld [vmem:[%s1337_s21 + $0xe8] sm:$0xff] }
  0x17   : > { %v1215_v26 = vld [vmem:[%s1337_s21 + $0x30] sm:$0xff]  ;;  %v1216_v30 = vld [vmem:[%s1337_s21 + $0x38] sm:$0xff] }
  0x18   : > { %v1223_v27 = vld [vmem:[%s1337_s21 + $0x70] sm:$0xff]  ;;  %v1224_v31 = vld [vmem:[%s1337_s21 + $0x78] sm:$0xff] }
  0x19   : > { %v1231_v28 = vld [vmem:[%s1337_s21 + $0xb0] sm:$0xff]  ;;  %v1232_v32 = vld [vmem:[%s1337_s21 + $0xb8] sm:$0xff] }
  0x1a   : > { %v1239_v29 = vld [vmem:[%s1337_s21 + $0xf0] sm:$0xff]  ;;  %v1240_v33 = vld [vmem:[%s1337_s21 + $0xf8] sm:$0xff] }
  0x21   : > { %1030 = vmatmul.msk.bf16.gmra.mxu0 %vm272_vm1, %v1210_v6  ;;  %1086 = vmatmul.msk.bf16.gmra.mxu1 %vm272_vm1, %v1218_v7 }
  0x22   : > { %1142 = vmatmul.msk.bf16.gmra.mxu2 %vm272_vm1, %v1226_v8 }
  0x23   : > { %1198 = vmatmul.msk.bf16.gmra.mxu3 %vm272_vm1, %v1234_v9 }
  0x31   : > { %1031 = vmatmul.msk.bf16.gmra.mxu0 %vm272_vm1, %v1211_v10  ;;  %1087 = vmatmul.msk.bf16.gmra.mxu1 %vm272_vm1, %v1219_v11 }
  0x32   : > { %1143 = vmatmul.msk.bf16.gmra.mxu2 %vm272_vm1, %v1227_v12 }
  0x33   : > { %1199 = vmatmul.msk.bf16.gmra.mxu3 %vm272_vm1, %v1235_v13 }
  0x41   : > { %1032 = vmatmul.msk.bf16.gmra.mxu0 %vm272_vm1, %v1212_v14  ;;  %1088 = vmatmul.msk.bf16.gmra.mxu1 %vm272_vm1, %v1220_v15 }
  0x42   : > { %1144 = vmatmul.msk.bf16.gmra.mxu2 %vm272_vm1, %v1228_v16 }
  0x43   : > { %1200 = vmatmul.msk.bf16.gmra.mxu3 %vm272_vm1, %v1236_v17 }
  0x51   : > { %1033 = vmatmul.msk.bf16.gmra.mxu0 %vm272_vm1, %v1213_v18  ;;  %1089 = vmatmul.msk.bf16.gmra.mxu1 %vm272_vm1, %v1221_v19 }
  0x52   : > { %1145 = vmatmul.msk.bf16.gmra.mxu2 %vm272_vm1, %v1229_v20 }
  0x53   : > { %1201 = vmatmul.msk.bf16.gmra.mxu3 %vm272_vm1, %v1237_v21 }
  0x61   : > { %1034 = vmatmul.msk.bf16.gmra.mxu0 %vm272_vm1, %v1214_v22  ;;  %1090 = vmatmul.msk.bf16.gmra.mxu1 %vm272_vm1, %v1222_v23 }
  0x62   : > { %1146 = vmatmul.msk.bf16.gmra.mxu2 %vm272_vm1, %v1230_v24 }
  0x63   : > { %1202 = vmatmul.msk.bf16.gmra.mxu3 %vm272_vm1, %v1238_v25 }
  0x71   : > { %1035 = vmatmul.msk.bf16.gmra.mxu0 %vm272_vm1, %v1215_v26  ;;  %1091 = vmatmul.msk.bf16.gmra.mxu1 %vm272_vm1, %v1223_v27 }
  0x72   : > { %1147 = vmatmul.msk.bf16.gmra.mxu2 %vm272_vm1, %v1231_v28 }
  0x73   : > { %1203 = vmatmul.msk.bf16.gmra.mxu3 %vm272_vm1, %v1239_v29 }
  0x81   : > { %1036 = vmatmul.msk.bf16.gmra.mxu0 %vm272_vm1, %v1216_v30  ;;  %1092 = vmatmul.msk.bf16.gmra.mxu1 %vm272_vm1, %v1224_v31 }
  0x82   : > { %1148 = vmatmul.msk.bf16.gmra.mxu2 %vm272_vm1, %v1232_v32 }
  0x83   : > { %1204 = vmatmul.msk.bf16.gmra.mxu3 %vm272_vm1, %v1240_v33 }
  0x8e   : > { %v310_v35 = vpop.f32.mrf.mxu0  ;;  %v456_v36 = vpop.f32.mrf.mxu1 }
  0x8f   : > { %v311_v37 = vadd.f32 %v1406_v34, %v310_v35  ;;  %v457_v38 = vadd.f32 %v1406_v34, %v456_v36 }
  0x91   : > { %v350_v39 = vmax.f32 %v311_v37, 0.0  ;;  %v496_v40 = vmax.f32 %v457_v38, 0.0 }
  0x93   : > { %v512_v43 = vadd.f32 %v496_v40, %v350_v39 }
  0x95   : > { %v618_v41 = vpop.f32.mrf.mxu2 }
  0x96   : > { %v780_v42 = vpop.f32.mrf.mxu3  ;;  %v619_v44 = vadd.f32 %v1406_v34, %v618_v41  ;;  %v312_v46 = vpop.f32.mrf.mxu0 }
  0x97   : > { %v781_v45 = vadd.f32 %v1406_v34, %v780_v42  ;;  %v458_v47 = vpop.f32.mrf.mxu1  ;;  %v313_v50 = vadd.f32 %v1406_v34, %v312_v46 }
  0x98   : > { %v658_v48 = vmax.f32 %v619_v44, 0.0  ;;  %v459_v51 = vadd.f32 %v1406_v34, %v458_v47 }
  0x99   : > { %v820_v49 = vmax.f32 %v781_v45, 0.0  ;;  %v351_v54 = vmax.f32 %v313_v50, 0.0 }
  0x9a   : > { %v674_v52 = vadd.f32 %v658_v48, %v512_v43  ;;  %v497_v55 = vmax.f32 %v459_v51, 0.0 }
  0x9c   : > { %v836_v53 = vadd.f32 %v820_v49, %v674_v52  ;;  %v513_v2 = vadd.f32 %v497_v55, %v351_v54 }
  0x9d   : > { %v620_v56 = vpop.f32.mrf.mxu2 }
  0x9e   : > { %v782_v57 = vpop.f32.mrf.mxu3  ;;  %v852_v58 = vmul.f32 0.25, %v836_v53  ;;  %v621_v59 = vadd.f32 %v1406_v34, %v620_v56  ;;  %v315_v61 = vpop.f32.mrf.mxu0 }
  0x9f   : > { %v783_v60 = vadd.f32 %v1406_v34, %v782_v57  ;;  %v461_v62 = vpop.f32.mrf.mxu1  ;;  %v316_v63 = vadd.f32 %v1406_v34, %v315_v61 }
  0xa0   : > { %v462_v0 = vadd.f32 %v1406_v34, %v461_v62  ;;  %v868_v1 = vpack.c.bf16 %v852_v58, %v852_v58  ;;  %v659_v3 = vmax.f32 %v621_v59, 0.0 }
  0xa1   : > { %v821_v5 = vmax.f32 %v783_v60, 0.0  ;;  %v352_v6 = vmax.f32 %v316_v63, 0.0 }
  0xa2   : > { %885 = vst.msk [vmem:[%s1420_s27] sm:$0xf] %vm884_vm2, %v868_v1  ;;  %v675_v4 = vadd.f32 %v659_v3, %v513_v2  ;;  %v498_v7 = vmax.f32 %v462_v0, 0.0 }
  0xa4   : > { %v837_v8 = vadd.f32 %v821_v5, %v675_v4  ;;  %v514_v12 = vadd.f32 %v498_v7, %v352_v6 }
  0xa5   : > { %v623_v9 = vpop.f32.mrf.mxu2 }
  0xa6   : > { %v785_v10 = vpop.f32.mrf.mxu3  ;;  %v853_v11 = vmul.f32 0.25, %v837_v8  ;;  %v624_v13 = vadd.f32 %v1406_v34, %v623_v9  ;;  %v317_v15 = vpop.f32.mrf.mxu0 }
  0xa7   : > { %v786_v14 = vadd.f32 %v1406_v34, %v785_v10  ;;  %v463_v16 = vpop.f32.mrf.mxu1  ;;  %v318_v17 = vadd.f32 %v1406_v34, %v317_v15 }
  0xa8   : > { %v869_v18 = vpack.c.bf16 %v853_v11, %v853_v11  ;;  %v660_v19 = vmax.f32 %v624_v13, 0.0  ;;  %v464_v21 = vadd.f32 %v1406_v34, %v463_v16 }
  0xa9   : > { %v822_v20 = vmax.f32 %v786_v14, 0.0  ;;  %v353_v24 = vmax.f32 %v318_v17, 0.0 }
  0xaa   : > { %886 = vst.msk [vmem:[%s1420_s27 + $0x4] sm:$0xf] %vm884_vm2, %v869_v18  ;;  %v676_v22 = vadd.f32 %v660_v19, %v514_v12  ;;  %v499_v25 = vmax.f32 %v464_v21, 0.0 }
  0xac   : > { %v838_v23 = vadd.f32 %v822_v20, %v676_v22  ;;  %v515_v37 = vadd.f32 %v499_v25, %v353_v24 }
  0xad   : > { %v625_v26 = vpop.f32.mrf.mxu2 }
  0xae   : > { %v787_v27 = vpop.f32.mrf.mxu3  ;;  %v854_v28 = vmul.f32 0.25, %v838_v23  ;;  %v626_v29 = vadd.f32 %v1406_v34, %v625_v26  ;;  %v320_v31 = vpop.f32.mrf.mxu0 }
  0xaf   : > { %v788_v30 = vadd.f32 %v1406_v34, %v787_v27  ;;  %v466_v32 = vpop.f32.mrf.mxu1  ;;  %v321_v33 = vadd.f32 %v1406_v34, %v320_v31 }
  0xb0   : > { %v467_v35 = vadd.f32 %v1406_v34, %v466_v32  ;;  %v870_v36 = vpack.c.bf16 %v854_v28, %v854_v28  ;;  %v661_v38 = vmax.f32 %v626_v29, 0.0 }
  0xb1   : > { %v823_v40 = vmax.f32 %v788_v30, 0.0  ;;  %v354_v41 = vmax.f32 %v321_v33, 0.0 }
  0xb2   : > { %887 = vst.msk [vmem:[%s1420_s27 + $0x8] sm:$0xf] %vm884_vm2, %v870_v36  ;;  %v677_v39 = vadd.f32 %v661_v38, %v515_v37  ;;  %v500_v42 = vmax.f32 %v467_v35, 0.0 }
  0xb4   : > { %v839_v43 = vadd.f32 %v823_v40, %v677_v39  ;;  %v516_v47 = vadd.f32 %v500_v42, %v354_v41 }
  0xb5   : > { %v628_v44 = vpop.f32.mrf.mxu2 }
  0xb6   : > { %v790_v45 = vpop.f32.mrf.mxu3  ;;  %v855_v46 = vmul.f32 0.25, %v839_v43  ;;  %v629_v48 = vadd.f32 %v1406_v34, %v628_v44  ;;  %v322_v50 = vpop.f32.mrf.mxu0 }
  0xb7   : > { %v791_v49 = vadd.f32 %v1406_v34, %v790_v45  ;;  %v468_v51 = vpop.f32.mrf.mxu1  ;;  %v323_v52 = vadd.f32 %v1406_v34, %v322_v50 }
  0xb8   : > { %v871_v53 = vpack.c.bf16 %v855_v46, %v855_v46  ;;  %v662_v54 = vmax.f32 %v629_v48, 0.0  ;;  %v469_v56 = vadd.f32 %v1406_v34, %v468_v51 }
  0xb9   : > { %v824_v55 = vmax.f32 %v791_v49, 0.0  ;;  %v355_v59 = vmax.f32 %v323_v52, 0.0 }
  0xba   : > { %888 = vst.msk [vmem:[%s1420_s27 + $0xc] sm:$0xf] %vm884_vm2, %v871_v53  ;;  %v678_v57 = vadd.f32 %v662_v54, %v516_v47  ;;  %v501_v60 = vmax.f32 %v469_v56, 0.0 }
  0xbc   : > { %v840_v58 = vadd.f32 %v824_v55, %v678_v57  ;;  %v517_v7 = vadd.f32 %v501_v60, %v355_v59 }
  0xbd   : > { %v630_v61 = vpop.f32.mrf.mxu2 }
  0xbe   : > { %v792_v62 = vpop.f32.mrf.mxu3  ;;  %v856_v63 = vmul.f32 0.25, %v840_v58  ;;  %v631_v0 = vadd.f32 %v1406_v34, %v630_v61  ;;  %v325_v2 = vpop.f32.mrf.mxu0 }
  0xbf   : > { %v793_v1 = vadd.f32 %v1406_v34, %v792_v62  ;;  %v471_v3 = vpop.f32.mrf.mxu1  ;;  %v326_v4 = vadd.f32 %v1406_v34, %v325_v2 }
  0xc0   : > { %v472_v5 = vadd.f32 %v1406_v34, %v471_v3  ;;  %v872_v6 = vpack.c.bf16 %v856_v63, %v856_v63  ;;  %v663_v8 = vmax.f32 %v631_v0, 0.0 }
  0xc1   : > { %v825_v10 = vmax.f32 %v793_v1, 0.0  ;;  %v356_v11 = vmax.f32 %v326_v4, 0.0 }
  0xc2   : > { %889 = vst.msk [vmem:[%s1420_s27 + $0x10] sm:$0xf] %vm884_vm2, %v872_v6  ;;  %v679_v9 = vadd.f32 %v663_v8, %v517_v7  ;;  %v502_v12 = vmax.f32 %v472_v5, 0.0 }
  0xc4   : > { %v841_v13 = vadd.f32 %v825_v10, %v679_v9  ;;  %v518_v17 = vadd.f32 %v502_v12, %v356_v11 }
  0xc5   : > { %v633_v14 = vpop.f32.mrf.mxu2 }
  0xc6   : > { %v795_v15 = vpop.f32.mrf.mxu3  ;;  %v857_v16 = vmul.f32 0.25, %v841_v13  ;;  %v634_v18 = vadd.f32 %v1406_v34, %v633_v14  ;;  %v327_v20 = vpop.f32.mrf.mxu0 }
  0xc7   : > { %v796_v19 = vadd.f32 %v1406_v34, %v795_v15  ;;  %v473_v21 = vpop.f32.mrf.mxu1  ;;  %v328_v22 = vadd.f32 %v1406_v34, %v327_v20 }
  0xc8   : > { %v873_v23 = vpack.c.bf16 %v857_v16, %v857_v16  ;;  %v664_v24 = vmax.f32 %v634_v18, 0.0  ;;  %v474_v26 = vadd.f32 %v1406_v34, %v473_v21 }
  0xc9   : > { %v826_v25 = vmax.f32 %v796_v19, 0.0  ;;  %v357_v29 = vmax.f32 %v328_v22, 0.0 }
  0xca   : > { %890 = vst.msk [vmem:[%s1420_s27 + $0x14] sm:$0xf] %vm884_vm2, %v873_v23  ;;  %v680_v27 = vadd.f32 %v664_v24, %v518_v17  ;;  %v503_v30 = vmax.f32 %v474_v26, 0.0 }
  0xcc   : > { %v842_v28 = vadd.f32 %v826_v25, %v680_v27  ;;  %v519_v42 = vadd.f32 %v503_v30, %v357_v29 }
  0xcd   : > { %v635_v31 = vpop.f32.mrf.mxu2 }
  0xce   : > { %v797_v32 = vpop.f32.mrf.mxu3  ;;  %v858_v33 = vmul.f32 0.25, %v842_v28  ;;  %v636_v35 = vadd.f32 %v1406_v34, %v635_v31  ;;  %v330_v37 = vpop.f32.mrf.mxu0 }
  0xcf   : > { %v798_v36 = vadd.f32 %v1406_v34, %v797_v32  ;;  %v476_v38 = vpop.f32.mrf.mxu1  ;;  %v331_v39 = vadd.f32 %v1406_v34, %v330_v37 }
  0xd0   : > { %v477_v40 = vadd.f32 %v1406_v34, %v476_v38  ;;  %v874_v41 = vpack.c.bf16 %v858_v33, %v858_v33  ;;  %v665_v43 = vmax.f32 %v636_v35, 0.0 }
  0xd1   : > { %v827_v45 = vmax.f32 %v798_v36, 0.0  ;;  %v358_v46 = vmax.f32 %v331_v39, 0.0 }
  0xd2   : > { %891 = vst.msk [vmem:[%s1420_s27 + $0x18] sm:$0xf] %vm884_vm2, %v874_v41  ;;  %v681_v44 = vadd.f32 %v665_v43, %v519_v42  ;;  %v504_v47 = vmax.f32 %v477_v40, 0.0 }
  0xd4   : > { %v843_v48 = vadd.f32 %v827_v45, %v681_v44  ;;  %v520_v52 = vadd.f32 %v504_v47, %v358_v46 }
  0xd5   : > { %v638_v49 = vpop.f32.mrf.mxu2 }
  0xd6   : > { %v800_v50 = vpop.f32.mrf.mxu3  ;;  %v859_v51 = vmul.f32 0.25, %v843_v48  ;;  %v639_v53 = vadd.f32 %v1406_v34, %v638_v49  ;;  %v332_v55 = vpop.f32.mrf.mxu0 }
  0xd7   : > { %v801_v54 = vadd.f32 %v1406_v34, %v800_v50  ;;  %v478_v56 = vpop.f32.mrf.mxu1  ;;  %v333_v57 = vadd.f32 %v1406_v34, %v332_v55 }
  0xd8   : > { %v875_v58 = vpack.c.bf16 %v859_v51, %v859_v51  ;;  %v666_v59 = vmax.f32 %v639_v53, 0.0  ;;  %v479_v61 = vadd.f32 %v1406_v34, %v478_v56 }
  0xd9   : > { %v828_v60 = vmax.f32 %v801_v54, 0.0  ;;  %v359_v0 = vmax.f32 %v333_v57, 0.0 }
  0xda   : > { %892 = vst.msk [vmem:[%s1420_s27 + $0x1c] sm:$0xf] %vm884_vm2, %v875_v58  ;;  %v682_v62 = vadd.f32 %v666_v59, %v520_v52  ;;  %v505_v1 = vmax.f32 %v479_v61, 0.0 }
  0xdc   : > { %v844_v63 = vadd.f32 %v828_v60, %v682_v62  ;;  %v521_v12 = vadd.f32 %v505_v1, %v359_v0 }
  0xdd   : > { %v640_v2 = vpop.f32.mrf.mxu2 }
  0xde   : > { %v802_v3 = vpop.f32.mrf.mxu3  ;;  %v860_v4 = vmul.f32 0.25, %v844_v63  ;;  %v641_v5 = vadd.f32 %v1406_v34, %v640_v2  ;;  %v335_v7 = vpop.f32.mrf.mxu0 }
  0xdf   : > { %v803_v6 = vadd.f32 %v1406_v34, %v802_v3  ;;  %v481_v8 = vpop.f32.mrf.mxu1  ;;  %v336_v9 = vadd.f32 %v1406_v34, %v335_v7 }
  0xe0   : > { %v482_v10 = vadd.f32 %v1406_v34, %v481_v8  ;;  %v876_v11 = vpack.c.bf16 %v860_v4, %v860_v4  ;;  %v667_v13 = vmax.f32 %v641_v5, 0.0 }
  0xe1   : > { %v829_v15 = vmax.f32 %v803_v6, 0.0  ;;  %v360_v16 = vmax.f32 %v336_v9, 0.0 }
  0xe2   : > { %893 = vst.msk [vmem:[%s1420_s27 + $0x20] sm:$0xf] %vm884_vm2, %v876_v11  ;;  %v683_v14 = vadd.f32 %v667_v13, %v521_v12  ;;  %v506_v17 = vmax.f32 %v482_v10, 0.0 }
  0xe4   : > { %v845_v18 = vadd.f32 %v829_v15, %v683_v14  ;;  %v522_v22 = vadd.f32 %v506_v17, %v360_v16 }
  0xe5   : > { %v643_v19 = vpop.f32.mrf.mxu2 }
  0xe6   : > { %v805_v20 = vpop.f32.mrf.mxu3  ;;  %v861_v21 = vmul.f32 0.25, %v845_v18  ;;  %v644_v23 = vadd.f32 %v1406_v34, %v643_v19  ;;  %v337_v25 = vpop.f32.mrf.mxu0 }
  0xe7   : > { %v806_v24 = vadd.f32 %v1406_v34, %v805_v20  ;;  %v483_v26 = vpop.f32.mrf.mxu1  ;;  %v338_v27 = vadd.f32 %v1406_v34, %v337_v25 }
  0xe8   : > { %v877_v28 = vpack.c.bf16 %v861_v21, %v861_v21  ;;  %v668_v29 = vmax.f32 %v644_v23, 0.0  ;;  %v484_v31 = vadd.f32 %v1406_v34, %v483_v26 }
  0xe9   : > { %v830_v30 = vmax.f32 %v806_v24, 0.0  ;;  %v361_v35 = vmax.f32 %v338_v27, 0.0 }
  0xea   : > { %894 = vst.msk [vmem:[%s1420_s27 + $0x24] sm:$0xf] %vm884_vm2, %v877_v28  ;;  %v684_v32 = vadd.f32 %v668_v29, %v522_v22  ;;  %v507_v36 = vmax.f32 %v484_v31, 0.0 }
  0xec   : > { %v846_v33 = vadd.f32 %v830_v30, %v684_v32  ;;  %v523_v47 = vadd.f32 %v507_v36, %v361_v35 }
  0xed   : > { %v645_v37 = vpop.f32.mrf.mxu2 }
  0xee   : > { %v807_v38 = vpop.f32.mrf.mxu3  ;;  %v862_v39 = vmul.f32 0.25, %v846_v33  ;;  %v646_v40 = vadd.f32 %v1406_v34, %v645_v37  ;;  %v340_v42 = vpop.f32.mrf.mxu0 }
  0xef   : > { %v808_v41 = vadd.f32 %v1406_v34, %v807_v38  ;;  %v486_v43 = vpop.f32.mrf.mxu1  ;;  %v341_v44 = vadd.f32 %v1406_v34, %v340_v42 }
  0xf0   : > { %v487_v45 = vadd.f32 %v1406_v34, %v486_v43  ;;  %v878_v46 = vpack.c.bf16 %v862_v39, %v862_v39  ;;  %v669_v48 = vmax.f32 %v646_v40, 0.0 }
  0xf1   : > { %v831_v50 = vmax.f32 %v808_v41, 0.0  ;;  %v362_v51 = vmax.f32 %v341_v44, 0.0 }
  0xf2   : > { %895 = vst.msk [vmem:[%s1420_s27 + $0x28] sm:$0xf] %vm884_vm2, %v878_v46  ;;  %v685_v49 = vadd.f32 %v669_v48, %v523_v47  ;;  %v508_v52 = vmax.f32 %v487_v45, 0.0 }
  0xf4   : > { %v847_v53 = vadd.f32 %v831_v50, %v685_v49  ;;  %v524_v57 = vadd.f32 %v508_v52, %v362_v51 }
  0xf5   : > { %v648_v54 = vpop.f32.mrf.mxu2 }
  0xf6   : > { %v810_v55 = vpop.f32.mrf.mxu3  ;;  %v863_v56 = vmul.f32 0.25, %v847_v53  ;;  %v649_v58 = vadd.f32 %v1406_v34, %v648_v54  ;;  %v342_v60 = vpop.f32.mrf.mxu0 }
  0xf7   : > { %v811_v59 = vadd.f32 %v1406_v34, %v810_v55  ;;  %v488_v61 = vpop.f32.mrf.mxu1  ;;  %v343_v62 = vadd.f32 %v1406_v34, %v342_v60 }
  0xf8   : > { %v879_v63 = vpack.c.bf16 %v863_v56, %v863_v56  ;;  %v670_v0 = vmax.f32 %v649_v58, 0.0  ;;  %v489_v2 = vadd.f32 %v1406_v34, %v488_v61 }
  0xf9   : > { %v832_v1 = vmax.f32 %v811_v59, 0.0  ;;  %v363_v5 = vmax.f32 %v343_v62, 0.0 }
  0xfa   : > { %896 = vst.msk [vmem:[%s1420_s27 + $0x2c] sm:$0xf] %vm884_vm2, %v879_v63  ;;  %v686_v3 = vadd.f32 %v670_v0, %v524_v57  ;;  %v509_v6 = vmax.f32 %v489_v2, 0.0 }
  0xfc   : > { %v848_v4 = vadd.f32 %v832_v1, %v686_v3  ;;  %v525_v17 = vadd.f32 %v509_v6, %v363_v5 }
  0xfd   : > { %v650_v7 = vpop.f32.mrf.mxu2 }
  0xfe   : > { %v812_v8 = vpop.f32.mrf.mxu3  ;;  %v864_v9 = vmul.f32 0.25, %v848_v4  ;;  %v651_v10 = vadd.f32 %v1406_v34, %v650_v7  ;;  %v345_v12 = vpop.f32.mrf.mxu0 }
  0xff   : > { %v813_v11 = vadd.f32 %v1406_v34, %v812_v8  ;;  %v491_v13 = vpop.f32.mrf.mxu1  ;;  %v346_v14 = vadd.f32 %v1406_v34, %v345_v12 }
 0x100   : > { %v492_v15 = vadd.f32 %v1406_v34, %v491_v13  ;;  %v880_v16 = vpack.c.bf16 %v864_v9, %v864_v9  ;;  %v671_v18 = vmax.f32 %v651_v10, 0.0 }
 0x101   : > { %v833_v20 = vmax.f32 %v813_v11, 0.0  ;;  %v364_v21 = vmax.f32 %v346_v14, 0.0 }
 0x102   : > { %897 = vst.msk [vmem:[%s1420_s27 + $0x30] sm:$0xf] %vm884_vm2, %v880_v16  ;;  %v687_v19 = vadd.f32 %v671_v18, %v525_v17  ;;  %v510_v22 = vmax.f32 %v492_v15, 0.0 }
 0x104   : > { %v849_v23 = vadd.f32 %v833_v20, %v687_v19  ;;  %v526_v27 = vadd.f32 %v510_v22, %v364_v21 }
 0x105   : > { %v653_v24 = vpop.f32.mrf.mxu2 }
 0x106   : > { %v815_v25 = vpop.f32.mrf.mxu3  ;;  %v865_v26 = vmul.f32 0.25, %v849_v23  ;;  %v654_v28 = vadd.f32 %v1406_v34, %v653_v24  ;;  %v347_v30 = vpop.f32.mrf.mxu0 }
 0x107   : > { %v816_v29 = vadd.f32 %v1406_v34, %v815_v25  ;;  %v493_v31 = vpop.f32.mrf.mxu1  ;;  %v348_v32 = vadd.f32 %v1406_v34, %v347_v30 }
 0x108   : > { %v881_v33 = vpack.c.bf16 %v865_v26, %v865_v26  ;;  %v672_v35 = vmax.f32 %v654_v28, 0.0  ;;  %v494_v37 = vadd.f32 %v1406_v34, %v493_v31 }
 0x109   : > { %v834_v36 = vmax.f32 %v816_v29, 0.0  ;;  %v365_v40 = vmax.f32 %v348_v32, 0.0 }
 0x10a   : > { %898 = vst.msk [vmem:[%s1420_s27 + $0x34] sm:$0xf] %vm884_vm2, %v881_v33  ;;  %v688_v38 = vadd.f32 %v672_v35, %v526_v27  ;;  %v511_v41 = vmax.f32 %v494_v37, 0.0 }
 0x10c   : > { %v850_v39 = vadd.f32 %v834_v36, %v688_v38  ;;  %v527_v48 = vadd.f32 %v511_v41, %v365_v40 }
 0x10d   : > { %v655_v42 = vpop.f32.mrf.mxu2 }
 0x10e   : > { %v817_v43 = vpop.f32.mrf.mxu3  ;;  %v866_v44 = vmul.f32 0.25, %v850_v39  ;;  %v656_v45 = vadd.f32 %v1406_v34, %v655_v42 }
 0x10f   : > { %v818_v46 = vadd.f32 %v1406_v34, %v817_v43 }
 0x110   : > { %v882_v47 = vpack.c.bf16 %v866_v44, %v866_v44  ;;  %v673_v49 = vmax.f32 %v656_v45, 0.0 }
 0x111   : > { %v835_v51 = vmax.f32 %v818_v46, 0.0 }
 0x112   : > { %899 = vst.msk [vmem:[%s1420_s27 + $0x38] sm:$0xf] %vm884_vm2, %v882_v47  ;;  %v689_v50 = vadd.f32 %v673_v49, %v527_v48 }
 0x114   : > { %v851_v52 = vadd.f32 %v835_v51, %v689_v50 }
 0x116   : > { %v867_v53 = vmul.f32 0.25, %v851_v52 }
 0x118   : > { %v883_v54 = vpack.c.bf16 %v867_v53, %v867_v53 }
 0x11a   : > { %900 = vst.msk [vmem:[%s1420_s27 + $0x3c] sm:$0xf] %vm884_vm2, %v883_v54 }
 0x11b PF: > { %s13_s14 = sadd.s32 1, %s1288_s14   ;;  %s1523_s12 = smov %s1284_s13 }
 0x11c   : > { %p10_p5 = scmp.ge.s32.totalorder %s13_s14, 4   ;;  %s1524_s13 = smov %s1526_s15 }
 0x11e   :  { %12 = sbr.rel (!%p10_p5) target bundleno = 2 (0x2), region = 65 }

</bundles_post_ra>
